<compile_context>
chip_gen: v7x
topology: tpu7x:2x2x1
jax: 0.10.0
libtpu: 0.0.40
codegen_flags: <defaults>
</compile_context>

<pallas_src>
import functools

import jax
import jax.numpy as jnp
from jax.experimental import pallas as pl
from jax.experimental.pallas import tpu as pltpu

LN_EPS = 1e-6


# ---------------------------------------------------------------------------
# Kernel
# ---------------------------------------------------------------------------
def _layernorm_kernel(*refs, eps, has_residual):
    if has_residual:
        x_ref, r_ref, g_ref, b_ref, o_ref = refs
        x = x_ref[...] + r_ref[...]                      # fused residual add
    else:
        x_ref, g_ref, b_ref, o_ref = refs
        x = x_ref[...]

    n = x.shape[-1]
    mean = jnp.mean(x, axis=-1, keepdims=True)
    d = x - mean
    # torch.std() default is unbiased (ddof = 1); reference divides by (std+eps)
    var = jnp.sum(d * d, axis=-1, keepdims=True) * (1.0 / float(n - 1))
    std = jnp.sqrt(var)
    # Exact reciprocal: only (tm, 1) values per tile, so this is negligible
    # work; the approx EUP reciprocal was not accurate enough for the check.
    inv = 1.0 / (std + eps)
    o_ref[...] = g_ref[...] * (d * inv) + b_ref[...]


# ---------------------------------------------------------------------------
# Wrapper
# ---------------------------------------------------------------------------
def layer_norm(x, gamma, beta, *, residual=None, eps=LN_EPS, block_rows=128):
    """LayerNorm over the last axis of `x` (optionally fused `x + residual`).

    x: (..., H) float array.  gamma/beta: (H,).  Returns same shape as x.
    """
    orig_shape = x.shape
    H = orig_shape[-1]

    x2 = x.reshape(-1, H).astype(jnp.float32)
    M = x2.shape[0]
    if residual is not None:
        r2 = residual.reshape(-1, H).astype(jnp.float32)

    # Row tile: multiple of 8 (sublane), capped at block_rows; pad M up to it.
    tm = min(block_rows, ((M + 7) // 8) * 8)
    Mp = ((M + tm - 1) // tm) * tm
    if Mp != M:
        pad = ((0, Mp - M), (0, 0))
        x2 = jnp.pad(x2, pad)
        if residual is not None:
            r2 = jnp.pad(r2, pad)

    grid = (Mp // tm,)
    row_spec = pl.BlockSpec((tm, H), lambda i: (i, 0))
    vec_spec = pl.BlockSpec((1, H), lambda i: (0, 0))

    in_specs = [row_spec]
    args = [x2]
    if residual is not None:
        in_specs.append(row_spec)
        args.append(r2)
    in_specs += [vec_spec, vec_spec]
    args += [gamma.reshape(1, H).astype(jnp.float32),
             beta.reshape(1, H).astype(jnp.float32)]

    out = pl.pallas_call(
        functools.partial(_layernorm_kernel, eps=eps,
                          has_residual=residual is not None),
        grid=grid,
        in_specs=in_specs,
        out_specs=row_spec,
        out_shape=jax.ShapeDtypeStruct((Mp, H), jnp.float32),
        compiler_params=pltpu.CompilerParams(
            dimension_semantics=("parallel",)),      # megacore on v7x
    )(*args)

    if Mp != M:
        out = out[:M]
    return out.reshape(orig_shape).astype(x.dtype)


# ---------------------------------------------------------------------------
# Pure-JAX reference (mirrors the PyTorch module exactly)
# ---------------------------------------------------------------------------
def layer_norm_ref(x, gamma, beta, eps=LN_EPS):
    x = x.astype(jnp.float32)
    mean = jnp.mean(x, axis=-1, keepdims=True)
    d = x - mean
    var = jnp.sum(d * d, axis=-1, keepdims=True) / float(x.shape[-1] - 1)
    std = jnp.sqrt(var)
    return gamma * d / (std + eps) + beta


if __name__ == "__main__":
    key = jax.random.PRNGKey(0)
    B, S, H = 2, 128, 256          # M = 256 rows -> grid of 2 row-tiles

    kx, kr, kg, kb = jax.random.split(key, 4)
    x = jax.random.normal(kx, (B, S, H), jnp.float32)
    res = jax.random.normal(kr, (B, S, H), jnp.float32)
    gamma = 1.0 + 0.02 * jax.random.normal(kg, (H,), jnp.float32)
    beta = 0.02 * jax.random.normal(kb, (H,), jnp.float32)

    # Plain LayerNorm (exact semantics of the PyTorch module).
    out = jax.jit(layer_norm)(x, gamma, beta)
    out = jax.block_until_ready(out)
    ref = layer_norm_ref(x, gamma, beta)
    assert out.shape == x.shape
    assert bool(jnp.all(jnp.isfinite(out)))
    assert float(jnp.max(jnp.abs(out - ref))) < 1e-3, "LayerNorm mismatch"

    # Fused residual + LayerNorm (optional fusion path).
    out_fused = jax.jit(lambda a, b, g, bt: layer_norm(a, g, bt, residual=b))(
        x, res, gamma, beta)
    out_fused = jax.block_until_ready(out_fused)
    ref_fused = layer_norm_ref(x + res, gamma, beta)
    assert float(jnp.max(jnp.abs(out_fused - ref_fused))) < 1e-3, \
        "fused residual LayerNorm mismatch"

    print("KERNEL_OK")
</pallas_src>

<mosaic_0001>
module attributes {stable_mosaic.version = 11 : i64} {
  func.func @_layernorm_kernel(%arg0: i32, %arg1: memref<128x256xf32, #tpu.memory_space<vmem>>, %arg2: memref<1x256xf32, #tpu.memory_space<vmem>>, %arg3: memref<1x256xf32, #tpu.memory_space<vmem>>, %arg4: memref<128x256xf32, #tpu.memory_space<vmem>>) attributes {dimension_semantics = [#tpu.dimension_semantics<parallel>], iteration_bounds = array<i64: 2>, scalar_prefetch = 0 : i64, scratch_operands = 0 : i64, tpu.core_type = #tpu.core_type<tc>, window_params = [{transform_indices = @transform_0, window_bounds = array<i64: 128, 256>}, {pipeline_mode = #tpu.pipeline_mode<synchronous>, transform_indices = @transform_1, window_bounds = array<i64: 1, 256>}, {pipeline_mode = #tpu.pipeline_mode<synchronous>, transform_indices = @transform_2, window_bounds = array<i64: 1, 256>}, {transform_indices = @transform_3, window_bounds = array<i64: 128, 256>}]} {
    %c0 = arith.constant 0 : index
    %c0_0 = arith.constant 0 : index
    %0 = vector.load %arg1[%c0, %c0_0] : memref<128x256xf32, #tpu.memory_space<vmem>>, vector<128x256xf32>
    %cst = arith.constant dense<0.000000e+00> : vector<128xf32>
    %1 = vector.multi_reduction <add>, %0, %cst [1] : vector<128x256xf32> to vector<128xf32>
    %2 = vector.shape_cast %1 : vector<128xf32> to vector<128x1xf32>
    %cst_1 = arith.constant 2.560000e+02 : f32
    %3 = vector.broadcast %cst_1 : f32 to vector<128x1xf32>
    %4 = arith.divf %2, %3 : vector<128x1xf32>
    %5 = vector.broadcast %4 : vector<128x1xf32> to vector<128x256xf32>
    %6 = arith.subf %0, %5 : vector<128x256xf32>
    %7 = arith.mulf %6, %6 : vector<128x256xf32>
    %cst_2 = arith.constant dense<0.000000e+00> : vector<128xf32>
    %8 = vector.multi_reduction <add>, %7, %cst_2 [1] : vector<128x256xf32> to vector<128xf32>
    %9 = vector.shape_cast %8 : vector<128xf32> to vector<128x1xf32>
    %cst_3 = arith.constant 0.00392156886 : f32
    %10 = vector.broadcast %cst_3 : f32 to vector<128x1xf32>
    %11 = arith.mulf %9, %10 : vector<128x1xf32>
    %12 = math.sqrt %11 : vector<128x1xf32>
    %cst_4 = arith.constant 9.99999997E-7 : f32
    %13 = vector.broadcast %cst_4 : f32 to vector<128x1xf32>
    %14 = arith.addf %12, %13 : vector<128x1xf32>
    %cst_5 = arith.constant 1.000000e+00 : f32
    %15 = vector.broadcast %cst_5 : f32 to vector<128x1xf32>
    %16 = arith.divf %15, %14 : vector<128x1xf32>
    %c0_6 = arith.constant 0 : index
    %c0_7 = arith.constant 0 : index
    %17 = vector.load %arg2[%c0_6, %c0_7] : memref<1x256xf32, #tpu.memory_space<vmem>>, vector<1x256xf32>
    %18 = vector.broadcast %16 : vector<128x1xf32> to vector<128x256xf32>
    %19 = arith.mulf %6, %18 : vector<128x256xf32>
    %20 = vector.broadcast %17 : vector<1x256xf32> to vector<128x256xf32>
    %21 = arith.mulf %20, %19 : vector<128x256xf32>
    %c0_8 = arith.constant 0 : index
    %c0_9 = arith.constant 0 : index
    %22 = vector.load %arg3[%c0_8, %c0_9] : memref<1x256xf32, #tpu.memory_space<vmem>>, vector<1x256xf32>
    %23 = vector.broadcast %22 : vector<1x256xf32> to vector<128x256xf32>
    %24 = arith.addf %21, %23 : vector<128x256xf32>
    %c0_10 = arith.constant 0 : index
    %c0_11 = arith.constant 0 : index
    %25 = vector.load %arg4[%c0_10, %c0_11] : memref<128x256xf32, #tpu.memory_space<vmem>>, vector<128x256xf32>
    tpu.vector_store %arg4[%c0_10, %c0_11], %24 {strides = array<i32>} : memref<128x256xf32, #tpu.memory_space<vmem>>, vector<128x256xf32>,
    return
  }
  func.func @transform_0(%arg0: i32) -> (i32, i32) {
    %c0_i32 = arith.constant 0 : i32
    %c0_i32_0 = arith.constant 0 : i32
    return %arg0, %c0_i32 : i32, i32
  }
  func.func @transform_1(%arg0: i32) -> (i32, i32) {
    %c0_i32 = arith.constant 0 : i32
    %c0_i32_0 = arith.constant 0 : i32
    %c0_i32_1 = arith.constant 0 : i32
    return %c0_i32, %c0_i32_0 : i32, i32
  }
  func.func @transform_2(%arg0: i32) -> (i32, i32) {
    %c0_i32 = arith.constant 0 : i32
    %c0_i32_0 = arith.constant 0 : i32
    %c0_i32_1 = arith.constant 0 : i32
    return %c0_i32, %c0_i32_0 : i32, i32
  }
  func.func @transform_3(%arg0: i32) -> (i32, i32) {
    %c0_i32 = arith.constant 0 : i32
    %c0_i32_0 = arith.constant 0 : i32
    return %arg0, %c0_i32 : i32, i32
  }
}

</mosaic_0001>

<bundles_post_ra>
// kernel: layer_norm.1
= control target key start
LH: loop header
LB: loop body
LE: loop exit
PB: predicated region body
PF: predicated region fallthrough
CT: control target
= control target key end

     0   :  { %8 = vsyncpa [#allocation3], 0  ;;  %s1841_s0 = inlined_call_operand.hbm [shape: f32[256,256], index: 0, kind: input, shape index: {}]   ;;  %s1842_s1 = inlined_call_operand.vmem [shape: f32[1,256], index: 1, kind: input, shape index: {}]   ;;  %s1843_s2 = inlined_call_operand.vmem [shape: f32[1,256], index: 2, kind: input, shape index: {}]   ;;  %s1844_s3 = inlined_call_operand.hbm [shape: f32[256,256], index: 3, kind: output, shape index: {}]  }
   0x1   :  { %10 = vsyncpa [#allocation3 + $0x1], 0 }
   0x2   :  { %11 = vsyncpa [#allocation4], 0 }
   0x3   :  { %13 = vsyncpa [#allocation4 + $0x1], 0  ;;  %s1075_s12 = smov 0   ;;  %s1077_s13 = smov 0  }
   0x4   :  { %s1079_s14 = smov 0   ;;  %s1081_s15 = smov 0  }
   0x5 LB: > { %s1096_s16 = sadd.s32 4294967295, %s1047_s15   ;;  %s817_s17 = sadd.s32 4294967294, %s1047_s15   ;;  %s1047_s15 = sphi %s1081_s15, %s1857_s15   ;;  %s1043_s14 = sphi %s1079_s14, %s1856_s14   ;;  %s1039_s13 = sphi %s1077_s13, %s1855_s13   ;;  %s1035_s12 = sphi %s1075_s12, %s1854_s12  }
   0x6   : > { %s1100_s18 = sadd.s32 1, %s1047_s15   ;;  %s26_s19 = sadd.s32 1, %s1043_s14 }
   0x7   : > { %s23_s20 = ssub.s32 %s1047_s15, %s1100_s18  ;;  %p33_p0 = scmp.ne.s32.totalorder %s1043_s14, %s1039_s13 }
   0x8   : > { %p24_p1 = scmp.eq.s32.totalorder %s23_s20, 0  ;;  %p34_p2 = scmp.eq.s32.totalorder %s1047_s15, 0 }
   0x9   : > { %p39_p3 = scmp.ne.s32.totalorder %s1039_s13, %s1035_s12  ;;  %p40_p4 = scmp.eq.s32.totalorder %s1096_s16, 0 }
   0xa   : > { %s1112_s21 = scalar_select %p24_p1, %s1043_s14, %s26_s19  }
   0xb   : > { %p1114_p5 = por %p34_p2, %p33_p0  ;;  %p1118_p6 = por %p40_p4, %p39_p3 }
   0xc   : > { %p105_p7 = scmp.eq.s32.totalorder %s1096_s16, 1  ;;  %p111_p8 = scmp.eq.s32.totalorder %s817_s17, 1 }
   0xd   : > { %p849_p10 = scmp.lt.s32.totalorder %s1047_s15, 2  ;;  %s137_s26 = sand.u32 1, %s1043_s14  }
   0xe   : > { %p1125_p11 = por %p105_p7, %p33_p0  ;;  %p1129_p12 = por %p111_p8, %p39_p3 }
   0xf   : > { %s834_s27 = sshll.u32 %s1047_s15, 12  ;;  %s820_s28 = sshll.u32 %s137_s26, 8 }
  0x10   : > { %s1848_s24 = scalar_select %p1125_p11, 1, 0 }
  0x11   : > { %s1849_s25 = scalar_select %p1129_p12, 1, 0 }
  0x12   : > { %s1138_s4 = scalar_lea.hbm %s1841_s0, %s834_s27  ;;  %s141_s5 = scalar_lea.vmem [#allocation2], %s820_s28 }
  0x13   : > { %s149_s6 = sshll.u32 %s141_s5, 4  ;;  %p1142_p13 = pnand %p849_p10, %p1114_p5  ;;  %s1146_s6 = int_to_ptr.vmem [resolvable:$true] %s149_s6 }
  0x14   : > { %s1148_s8 = scalar_lea.sflag [#allocation3], %s137_s26  ;;  %s951_s9 = scalar_lea.hbm %s1138_s4, 4096 }
  0x15   : > { %p952_p0 = scmp.ne.s32.totalorder %s1138_s4, %s951_s9  ;;  %p953_p1 = pneg %p1142_p13 }
  0x16   : > { %s956_s17 = scalar_lea.hbm %s1841_s0, 8192  ;;  %p957_p4 = scmp.lt.u32.totalorder %s1138_s4, %s1841_s0 }
  0x17   : > { %p954_p2 = pnand %p953_p1, %p952_p0  ;;  %p958_p5 = scmp.lt.u32.totalorder %s956_s17, %s951_s9 }
  0x18   : > { %p960_p8 = scmp.lt.u32.totalorder %s951_s9, %s1138_s4 }
  0x19   : > { %p955_p3 = pneg %p954_p2  ;;  %p959_p7 = por %p958_p5, %p957_p4 }
  0x1b   : > { %p961_p10 = por %p960_p8, %p959_p7 }
  0x1d   : > { %p962_p9 = pnand %p961_p10, %p955_p3 }
  0x1f   : > { %965 = shalt.err (!%p962_p9)
}
  0x20   : > { %s966_s22 = scalar_lea.vmem %s1146_s6, 4096  ;;  %s1049_s26 = smov [#allocation2]  }
  0x21   : > { %p967_p0 = scmp.ne.s32.totalorder %s1146_s6, %s966_s22  ;;  %s971_s27 = sshll.u32 %s1049_s26, 4  ;;  %s972_s27 = int_to_ptr.vmem [resolvable:$false] %s971_s27 }
  0x22   : > { %s973_s28 = scalar_lea.vmem %s972_s27, 8192  ;;  %p974_p11 = scmp.lt.s32.totalorder %s1146_s6, %s972_s27 }
  0x23   : > { %p969_p2 = pnand %p967_p0, %p953_p1  ;;  %p975_p4 = scmp.lt.s32.totalorder %s973_s28, %s966_s22 }
  0x25   : > { %p970_p12 = pneg %p969_p2  ;;  %p976_p5 = por %p975_p4, %p974_p11 }
  0x27   : > { %p977_p7 = pnand %p976_p5, %p970_p12 }
  0x29   : > { %980 = shalt.err (!%p977_p7)
}
  0x2a   : > { %s1050_s29 = smov 256   ;;  %s1051_s30 = smov 16  }
  0x2b   : > { %844 = dma.hbm_to_vmem [thread:$0]  (!%p1142_p13), %s1138_s4, 4096, %s1146_s6, %s1148_s8, %s1050_s29, %s1050_s29, %s1051_s30  }
  0x2c   : > { %p824_p9 = scmp.ge.s32.totalorder %s1047_s15, 1  ;;  %p157_p1 = scmp.lt.s32.totalorder %s1047_s15, 3 }
  0x2e   : > { %p158_p3 = pnand %p824_p9, %p157_p1 }
  0x2f   : > { %s1179_s5 = sand.u32 (!%p158_p3), 1, %s1039_s13  }
  0x30   : > { %161 = sbr.rel (%p158_p3) target bundleno = 456 (0x1c8), region = 32  ;;  %s825_s9 = sshll.u32 (!%p158_p3), %s1179_s5, 8 }
  0x31   : > { %s164_s10 = scalar_lea.sflag (!%p158_p3), [#allocation3], %s1179_s5  ;;  %s1185_s11 = scalar_lea.vmem (!%p158_p3), [#allocation2], %s825_s9 }
  0x37   : > { %1026 = dma.done.wait (%p1118_p6), %s164_s10, 4096  }
  0x38   : > { %1028 = vsyncadd (%p1118_p6), %s164_s10, 4294963200  ;;  %v1192_v0 = vld [vmem:[%s1185_s11] sm:$0xff]  ;;  %v1195_v1 = vld [vmem:[%s1185_s11 + $0x8] sm:$0xff]  ;;  %s1606_s8 = scalar_lea.vmem [#allocation5], %s825_s9  ;;  %s836_s17 = sshll.u32 %s1096_s16, 12 }
  0x39   : > { %v1198_v2 = vld [vmem:[%s1185_s11 + $0x20] sm:$0xff]  ;;  %v224_v3 = vadd.f32 %v1195_v1, %v1192_v0  ;;  %v1203_v4 = vld [vmem:[%s1185_s11 + $0x28] sm:$0xff]  ;;  %v1206_v5 = vld [vmem:[%s1185_s11 + $0x10] sm:$0xff]  ;;  %s744_s19 = sshll.u32 %s1606_s8, 4  ;;  %s1791_s26 = scalar_lea.hbm %s1844_s3, %s836_s17  ;;  %s1793_s19 = int_to_ptr.vmem [resolvable:$true] %s744_s19 }
  0x3a   : > { %v1209_v6 = vld [vmem:[%s1185_s11 + $0x18] sm:$0xff]  ;;  %v230_v7 = vadd.f32 %v1203_v4, %v1198_v2  ;;  %v1214_v8 = vld [vmem:[%s1185_s11 + $0x30] sm:$0xff]  ;;  %v1224_v12 = vld [vmem:[%s1185_s11 + $0x40] sm:$0xff]  ;;  %s730_s16 = scalar_lea.sflag [#allocation4], %s1179_s5  ;;  %s981_s27 = scalar_lea.vmem %s1793_s19, 4096 }
  0x3b   : > { %v1217_v9 = vld [vmem:[%s1185_s11 + $0x38] sm:$0xff]  ;;  %225 = vadd.xlane.f32.xlu0 %v224_v3  ;;  %v227_v10 = vadd.f32 %v1209_v6, %v1206_v5  ;;  %v1227_v13 = vld [vmem:[%s1185_s11 + $0x48] sm:$0xff]  ;;  %v1230_v14 = vld [vmem:[%s1185_s11 + $0x50] sm:$0xff]  ;;  %p982_p6 = scmp.ne.s32.totalorder %s1793_s19, %s981_s27  ;;  %p1851_p11 = scmp.ne.s32.totalorder %s1848_s24, 0 }
  0x3c   : > { %231 = vadd.xlane.f32.xlu1 %v230_v7  ;;  %v233_v11 = vadd.f32 %v1217_v9, %v1214_v8  ;;  %v1233_v15 = vld [vmem:[%s1185_s11 + $0x58] sm:$0xff]  ;;  %v236_v16 = vadd.f32 %v1227_v13, %v1224_v12  ;;  %v1240_v18 = vld [vmem:[%s1185_s11 + $0x60] sm:$0xff]  ;;  %v1243_v19 = vld [vmem:[%s1185_s11 + $0x68] sm:$0xff]  ;;  %s1052_s28 = smov [#allocation5]  }
  0x3d   : > { %v239_v17 = vadd.f32 %v1233_v15, %v1230_v14  ;;  %v1246_v20 = vld [vmem:[%s1185_s11 + $0x70] sm:$0xff]  ;;  %v1249_v21 = vld [vmem:[%s1185_s11 + $0x78] sm:$0xff]  ;;  %v242_v22 = vadd.f32 %v1243_v19, %v1240_v18  ;;  %v1256_v24 = vld [vmem:[%s1185_s11 + $0x80] sm:$0xff]  ;;  %p983_p12 = pnand %p982_p6, %p1851_p11  ;;  %s985_s29 = sshll.u32 %s1052_s28, 4  ;;  %s986_s29 = int_to_ptr.vmem [resolvable:$false] %s985_s29 }
  0x3e   : > { %v245_v23 = vadd.f32 %v1249_v21, %v1246_v20  ;;  %v1259_v25 = vld [vmem:[%s1185_s11 + $0x88] sm:$0xff]  ;;  %v1262_v26 = vld [vmem:[%s1185_s11 + $0x90] sm:$0xff]  ;;  %v1265_v27 = vld [vmem:[%s1185_s11 + $0x98] sm:$0xff]  ;;  %s987_s30 = scalar_lea.vmem %s986_s29, 8192  ;;  %p988_p8 = scmp.lt.s32.totalorder %s1793_s19, %s986_s29 }
  0x3f   : > { %228 = vadd.xlane.f32.xlu0 %v227_v10  ;;  %v248_v28 = vadd.f32 %v1259_v25, %v1256_v24  ;;  %v251_v29 = vadd.f32 %v1265_v27, %v1262_v26  ;;  %v1272_v30 = vld [vmem:[%s1185_s11 + $0xa0] sm:$0xff]  ;;  %v1275_v31 = vld [vmem:[%s1185_s11 + $0xa8] sm:$0xff]  ;;  %v1278_v32 = vld [vmem:[%s1185_s11 + $0xb0] sm:$0xff]  ;;  %p984_p13 = pneg %p983_p12  ;;  %p989_p10 = scmp.lt.s32.totalorder %s987_s30, %s981_s27 }
  0x40   : > { %234 = vadd.xlane.f32.xlu1 %v233_v11  ;;  %v1281_v33 = vld [vmem:[%s1185_s11 + $0xb8] sm:$0xff]  ;;  %v254_v34 = vadd.f32 %v1275_v31, %v1272_v30  ;;  %v1288_v36 = vld [vmem:[%s1185_s11 + $0xc0] sm:$0xff]  ;;  %v1291_v37 = vld [vmem:[%s1185_s11 + $0xc8] sm:$0xff] }
  0x41   : > { %v257_v35 = vadd.f32 %v1281_v33, %v1278_v32  ;;  %v1294_v38 = vld [vmem:[%s1185_s11 + $0xd0] sm:$0xff]  ;;  %v1297_v39 = vld [vmem:[%s1185_s11 + $0xd8] sm:$0xff]  ;;  %v260_v40 = vadd.f32 %v1291_v37, %v1288_v36  ;;  %v1304_v42 = vld [vmem:[%s1185_s11 + $0xe0] sm:$0xff]  ;;  %p990_p0 = por %p989_p10, %p988_p8 }
  0x42   : > { %v263_v41 = vadd.f32 %v1297_v39, %v1294_v38  ;;  %v1307_v43 = vld [vmem:[%s1185_s11 + $0xe8] sm:$0xff]  ;;  %v1310_v44 = vld [vmem:[%s1185_s11 + $0xf0] sm:$0xff]  ;;  %v1313_v45 = vld [vmem:[%s1185_s11 + $0xf8] sm:$0xff] }
  0x43   : > { %237 = vadd.xlane.f32.xlu0 %v236_v16  ;;  %v266_v46 = vadd.f32 %v1307_v43, %v1304_v42  ;;  %v269_v47 = vadd.f32 %v1313_v45, %v1310_v44  ;;  %p991_p2 = pnand %p990_p0, %p984_p13 }
  0x44   : > { %240 = vadd.xlane.f32.xlu1 %v239_v17 }
  0x47   : > { %243 = vadd.xlane.f32.xlu0 %v242_v22 }
  0x48   : > { %246 = vadd.xlane.f32.xlu1 %v245_v23 }
  0x4b   : > { %249 = vadd.xlane.f32.xlu0 %v248_v28 }
  0x4c   : > { %252 = vadd.xlane.f32.xlu1 %v251_v29 }
  0x4f   : > { %255 = vadd.xlane.f32.xlu0 %v254_v34 }
  0x50   : > { %258 = vadd.xlane.f32.xlu1 %v257_v35 }
  0x53   : > { %261 = vadd.xlane.f32.xlu0 %v260_v40 }
  0x54   : > { %264 = vadd.xlane.f32.xlu1 %v263_v41 }
  0x57   : > { %267 = vadd.xlane.f32.xlu0 %v266_v46 }
  0x58   : > { %270 = vadd.xlane.f32.xlu1 %v269_v47 }
  0xc8   : > { %v226_v48 = vpop.xlane.xlu0 %225 }
  0xc9   : > { %v273_v49 = vmul.f32 0.00390625, %v226_v48  ;;  %v232_v50 = vpop.xlane.xlu1 %231 }
  0xca   : > { %v275_v51 = vmul.f32 0.00390625, %v232_v50 }
  0xcb   : > { %v1320_v52 = vsub.f32 %v1192_v0, %v273_v49  ;;  %v1323_v53 = vsub.f32 %v1195_v1, %v273_v49 }
  0xcc   : > { %v1326_v54 = vsub.f32 %v1198_v2, %v275_v51  ;;  %v1329_v55 = vsub.f32 %v1203_v4, %v275_v51  ;;  %v229_v56 = vpop.xlane.xlu0 %228 }
  0xcd   : > { %v274_v57 = vmul.f32 0.00390625, %v229_v56  ;;  %v235_v58 = vpop.xlane.xlu1 %234  ;;  %v321_v59 = vmul.f32 %v1320_v52, %v1320_v52  ;;  %v322_v60 = vmul.f32 %v1323_v53, %v1323_v53 }
  0xce   : > { %v276_v61 = vmul.f32 0.00390625, %v235_v58  ;;  %v325_v62 = vmul.f32 %v1326_v54, %v1326_v54  ;;  %v326_v63 = vmul.f32 %v1329_v55, %v1329_v55 }
  0xcf   : > { %v1340_v0 = vsub.f32 %v1206_v5, %v274_v57  ;;  %v1343_v1 = vsub.f32 %v1209_v6, %v274_v57  ;;  %v353_v2 = vadd.f32 %v322_v60, %v321_v59 }
  0xd0   : > { %v1346_v3 = vsub.f32 %v1214_v8, %v276_v61  ;;  %v1349_v4 = vsub.f32 %v1217_v9, %v276_v61  ;;  %v238_v7 = vpop.xlane.xlu0 %237  ;;  %v359_v16 = vadd.f32 %v326_v63, %v325_v62 }
  0xd1   : > { %v277_v10 = vmul.f32 0.00390625, %v238_v7  ;;  %354 = vadd.xlane.f32.xlu0 %v353_v2  ;;  %v241_v11 = vpop.xlane.xlu1 %240  ;;  %v323_v17 = vmul.f32 %v1340_v0, %v1340_v0  ;;  %v324_v5 = vmul.f32 %v1343_v1, %v1343_v1 }
  0xd2   : > { %v278_v6 = vmul.f32 0.00390625, %v241_v11  ;;  %v327_v22 = vmul.f32 %v1346_v3, %v1346_v3  ;;  %v328_v8 = vmul.f32 %v1349_v4, %v1349_v4 }
  0xd3   : > { %v1360_v9 = vsub.f32 %v1224_v12, %v277_v10  ;;  %v1363_v23 = vsub.f32 %v1227_v13, %v277_v10  ;;  %v356_v28 = vadd.f32 %v324_v5, %v323_v17 }
  0xd4   : > { %v1366_v29 = vsub.f32 %v1230_v14, %v278_v6  ;;  %v1369_v34 = vsub.f32 %v1233_v15, %v278_v6  ;;  %v244_v35 = vpop.xlane.xlu0 %243  ;;  %v362_v46 = vadd.f32 %v328_v8, %v327_v22 }
  0xd5   : > { %v279_v40 = vmul.f32 0.00390625, %v244_v35  ;;  %360 = vadd.xlane.f32.xlu0 %v359_v16  ;;  %357 = vadd.xlane.f32.xlu1 %v356_v28  ;;  %v247_v41 = vpop.xlane.xlu1 %246  ;;  %v329_v12 = vmul.f32 %v1360_v9, %v1360_v9  ;;  %v330_v13 = vmul.f32 %v1363_v23, %v1363_v23 }
  0xd6   : > { %v280_v47 = vmul.f32 0.00390625, %v247_v41  ;;  %v331_v14 = vmul.f32 %v1366_v29, %v1366_v29  ;;  %v332_v15 = vmul.f32 %v1369_v34, %v1369_v34 }
  0xd7   : > { %v1380_v48 = vsub.f32 %v1240_v18, %v279_v40  ;;  %v1383_v49 = vsub.f32 %v1243_v19, %v279_v40  ;;  %v365_v50 = vadd.f32 %v330_v13, %v329_v12 }
  0xd8   : > { %v1386_v51 = vsub.f32 %v1246_v20, %v280_v47  ;;  %v1389_v56 = vsub.f32 %v1249_v21, %v280_v47  ;;  %v250_v57 = vpop.xlane.xlu0 %249  ;;  %v368_v60 = vadd.f32 %v332_v15, %v331_v14 }
  0xd9   : > { %v281_v58 = vmul.f32 0.00390625, %v250_v57  ;;  %363 = vadd.xlane.f32.xlu1 %v362_v46  ;;  %366 = vadd.xlane.f32.xlu0 %v365_v50  ;;  %v253_v59 = vpop.xlane.xlu1 %252  ;;  %v333_v18 = vmul.f32 %v1380_v48, %v1380_v48  ;;  %v334_v19 = vmul.f32 %v1383_v49, %v1383_v49 }
  0xda   : > { %v282_v61 = vmul.f32 0.00390625, %v253_v59  ;;  %v335_v20 = vmul.f32 %v1386_v51, %v1386_v51  ;;  %v336_v21 = vmul.f32 %v1389_v56, %v1389_v56 }
  0xdb   : > { %v1400_v62 = vsub.f32 %v1256_v24, %v281_v58  ;;  %v1403_v63 = vsub.f32 %v1259_v25, %v281_v58  ;;  %v371_v2 = vadd.f32 %v334_v19, %v333_v18 }
  0xdc   : > { %v1406_v7 = vsub.f32 %v1262_v26, %v282_v61  ;;  %v1409_v10 = vsub.f32 %v1265_v27, %v282_v61  ;;  %v256_v11 = vpop.xlane.xlu0 %255  ;;  %v374_v5 = vadd.f32 %v336_v21, %v335_v20 }
  0xdd   : > { %v283_v16 = vmul.f32 0.00390625, %v256_v11  ;;  %369 = vadd.xlane.f32.xlu1 %v368_v60  ;;  %372 = vadd.xlane.f32.xlu0 %v371_v2  ;;  %v259_v17 = vpop.xlane.xlu1 %258  ;;  %v337_v24 = vmul.f32 %v1400_v62, %v1400_v62  ;;  %v338_v25 = vmul.f32 %v1403_v63, %v1403_v63 }
  0xde   : > { %v284_v6 = vmul.f32 0.00390625, %v259_v17  ;;  %v339_v26 = vmul.f32 %v1406_v7, %v1406_v7  ;;  %v340_v27 = vmul.f32 %v1409_v10, %v1409_v10 }
  0xdf   : > { %v1420_v22 = vsub.f32 %v1272_v30, %v283_v16  ;;  %v1423_v8 = vsub.f32 %v1275_v31, %v283_v16  ;;  %v377_v28 = vadd.f32 %v338_v25, %v337_v24  ;;  %v611_v25 = vlaneseq }
  0xe0   : > { %v1426_v35 = vsub.f32 %v1278_v32, %v284_v6  ;;  %v1429_v40 = vsub.f32 %v1281_v33, %v284_v6  ;;  %v262_v41 = vpop.xlane.xlu0 %261  ;;  %v380_v13 = vadd.f32 %v340_v27, %v339_v26 }
  0xe1   : > { %v285_v46 = vmul.f32 0.00390625, %v262_v41  ;;  %375 = vadd.xlane.f32.xlu1 %v374_v5  ;;  %378 = vadd.xlane.f32.xlu0 %v377_v28  ;;  %v265_v12 = vpop.xlane.xlu1 %264  ;;  %v341_v30 = vmul.f32 %v1420_v22, %v1420_v22  ;;  %v342_v31 = vmul.f32 %v1423_v8, %v1423_v8  ;;  %v612_v27 = vshrl.u32 %v611_v25, 7 }
  0xe2   : > { %v286_v47 = vmul.f32 0.00390625, %v265_v12  ;;  %v343_v32 = vmul.f32 %v1426_v35, %v1426_v35  ;;  %v344_v33 = vmul.f32 %v1429_v40, %v1429_v40 }
  0xe3   : > { %v1440_v14 = vsub.f32 %v1288_v36, %v285_v46  ;;  %v1443_v15 = vsub.f32 %v1291_v37, %v285_v46  ;;  %v383_v50 = vadd.f32 %v342_v31, %v341_v30  ;;  %v577_v30 = vld [vmem:[%s1842_s1] sm:$0x3]  ;;  %v617_v31 = vsub.s32 1, %v612_v27 }
  0xe4   : > { %v1446_v57 = vsub.f32 %v1294_v38, %v286_v47  ;;  %v1449_v58 = vsub.f32 %v1297_v39, %v286_v47  ;;  %v268_v59 = vpop.xlane.xlu0 %267  ;;  %v386_v19 = vadd.f32 %v344_v33, %v343_v32  ;;  %v653_v33 = vld [vmem:[%s1843_s2] sm:$0x3] }
  0xe5   : > { %v287_v60 = vmul.f32 0.00390625, %v268_v59  ;;  %381 = vadd.xlane.f32.xlu1 %v380_v13  ;;  %384 = vadd.xlane.f32.xlu0 %v383_v50  ;;  %v271_v18 = vpop.xlane.xlu1 %270  ;;  %v345_v36 = vmul.f32 %v1440_v14, %v1440_v14  ;;  %v346_v37 = vmul.f32 %v1443_v15, %v1443_v15  ;;  %v613_v13 = vsub.s32 0, %v612_v27 }
  0xe6   : > { %v288_v61 = vmul.f32 0.00390625, %v271_v18  ;;  %v347_v38 = vmul.f32 %v1446_v57, %v1446_v57  ;;  %v348_v39 = vmul.f32 %v1449_v58, %v1449_v58  ;;  %v1495_v18 = vrot.slane %v577_v30, %v617_v31 }
  0xe7   : > { %v1460_v20 = vsub.f32 %v1304_v42, %v287_v60  ;;  %v1463_v21 = vsub.f32 %v1307_v43, %v287_v60  ;;  %v389_v2 = vadd.f32 %v346_v37, %v345_v36  ;;  %v1492_v60 = vrot.slane %v577_v30, %v613_v13 }
  0xe8   : > { %v1466_v11 = vsub.f32 %v1310_v44, %v288_v61  ;;  %v1469_v16 = vsub.f32 %v1313_v45, %v288_v61  ;;  %v392_v17 = vadd.f32 %v348_v39, %v347_v38  ;;  %v1499_v36 = vrot.slane %v653_v33, %v617_v31 }
  0xe9   : > { %387 = vadd.xlane.f32.xlu1 %v386_v19  ;;  %390 = vadd.xlane.f32.xlu0 %v389_v2  ;;  %v349_v5 = vmul.f32 %v1460_v20, %v1460_v20  ;;  %v350_v42 = vmul.f32 %v1463_v21, %v1463_v21  ;;  %v1497_v19 = vrot.slane %v653_v33, %v613_v13 }
  0xea   : > { %v351_v43 = vmul.f32 %v1466_v11, %v1466_v11  ;;  %v352_v24 = vmul.f32 %v1469_v16, %v1469_v16 }
  0xeb   : > { %v395_v44 = vadd.f32 %v350_v42, %v349_v5 }
  0xec   : > { %v398_v45 = vadd.f32 %v352_v24, %v351_v43 }
  0xed   : > { %393 = vadd.xlane.f32.xlu1 %v392_v17  ;;  %396 = vadd.xlane.f32.xlu0 %v395_v44 }
  0xf1   : > { %399 = vadd.xlane.f32.xlu1 %v398_v45 }
 0x15e   : > { %v355_v6 = vpop.xlane.xlu0 %354 }
 0x15f   : > { %v401_v26 = vmul.f32 0.003921569, %v355_v6 }
 0x161   : > { %887 = vrsqrt.f32 %v401_v26  ;;  %vm419_vm0 = vcmp.eq.f32.partialorder %v401_v26, inf  ;;  %vm421_vm1 = vcmp.eq.f32.partialorder %v401_v26, 0.0  ;;  %v422_v5 = vand.u32 2147483648, %v401_v26 }
 0x162   : > { %v358_v28 = vpop.xlane.xlu1 %357  ;;  %v361_v41 = vpop.xlane.xlu0 %360 }
 0x163   : > { %v402_v46 = vmul.f32 0.003921569, %v358_v28  ;;  %v1479_v12 = vmul.f32 0.003921569, %v361_v41 }
 0x165   : > { %889 = vrsqrt.f32 %v402_v46  ;;  %vm426_vm2 = vcmp.eq.f32.partialorder %v402_v46, inf  ;;  %vm428_vm3 = vcmp.eq.f32.partialorder %v402_v46, 0.0  ;;  %v429_v42 = vand.u32 2147483648, %v402_v46 }
 0x166   : > { %891 = vrsqrt.f32 %v1479_v12  ;;  %v364_v47 = vpop.xlane.xlu1 %363  ;;  %v367_v32 = vpop.xlane.xlu0 %366  ;;  %vm433_vm4 = vcmp.eq.f32.partialorder %v1479_v12, inf  ;;  %vm435_vm5 = vcmp.eq.f32.partialorder %v1479_v12, 0.0  ;;  %v436_v24 = vand.u32 2147483648, %v1479_v12 }
 0x167   : > { %v1488_v50 = vmul.f32 0.003921569, %v364_v47  ;;  %v1490_v59 = vmul.f32 0.003921569, %v367_v32 }
 0x169   : > { %893 = vrsqrt.f32 %v1488_v50  ;;  %vm440_vm6 = vcmp.eq.f32.partialorder %v1488_v50, inf  ;;  %vm442_vm7 = vcmp.eq.f32.partialorder %v1488_v50, 0.0  ;;  %v443_v31 = vand.u32 2147483648, %v1488_v50 }
 0x16a   : > { %895 = vrsqrt.f32 %v1490_v59  ;;  %v370_v37 = vpop.xlane.xlu1 %369  ;;  %v373_v61 = vpop.xlane.xlu0 %372  ;;  %vm447_vm8 = vcmp.eq.f32.partialorder %v1490_v59, inf  ;;  %vm449_vm9 = vcmp.eq.f32.partialorder %v1490_v59, 0.0 }
 0x16b   : > { %v888_v38 = vpop.eup %887  ;;  %v1502_v39 = vmul.f32 0.003921569, %v370_v37  ;;  %v1504_v2 = vmul.f32 0.003921569, %v373_v61 }
 0x16c   : > { %v418_v17 = vmul.f32 %v888_v38, %v401_v26 }
 0x16d   : > { %897 = vrsqrt.f32 %v1502_v39  ;;  %vm454_vm10 = vcmp.eq.f32.partialorder %v1502_v39, inf  ;;  %vm456_vm11 = vcmp.eq.f32.partialorder %v1502_v39, 0.0  ;;  %vm461_vm12 = vcmp.eq.f32.partialorder %v1504_v2, inf }
 0x16e   : > { %v420_v43 = vsel %vm419_vm0, %v401_v26, %v418_v17  ;;  %899 = vrsqrt.f32 %v1504_v2  ;;  %v376_v44 = vpop.xlane.xlu1 %375  ;;  %v379_v45 = vpop.xlane.xlu0 %378  ;;  %v450_v26 = vand.u32 2147483648, %v1490_v59  ;;  %v457_v17 = vand.u32 2147483648, %v1502_v39 }
 0x16f   : > { %v890_v25 = vpop.eup %889  ;;  %v423_v6 = vsel %vm421_vm1, %v422_v5, %v420_v43  ;;  %v1514_v27 = vmul.f32 0.003921569, %v376_v44  ;;  %v1516_v28 = vmul.f32 0.003921569, %v379_v45  ;;  %vm463_vm13 = vcmp.eq.f32.partialorder %v1504_v2, 0.0 }
 0x170   : > { %v892_v41 = vpop.eup %891  ;;  %v529_v13 = vadd.f32 1e-06, %v423_v6  ;;  %v425_v30 = vmul.f32 %v890_v25, %v402_v46 }
 0x171   : > { %v432_v47 = vmul.f32 %v892_v41, %v1479_v12  ;;  %901 = vrsqrt.f32 %v1514_v27  ;;  %vm468_vm14 = vcmp.eq.f32.partialorder %v1514_v27, inf  ;;  %vm470_vm15 = vcmp.eq.f32.partialorder %v1514_v27, 0.0 }
 0x172   : > { %903 = vrcp.f32 %v529_v13  ;;  %v427_v32 = vsel %vm426_vm2, %v402_v46, %v425_v30  ;;  %v382_v33 = vpop.xlane.xlu1 %381  ;;  %v385_v25 = vpop.xlane.xlu0 %384  ;;  %vm475_vm0 = vcmp.eq.f32.partialorder %v1516_v28, inf  ;;  %vm477_vm1 = vcmp.eq.f32.partialorder %v1516_v28, 0.0 }
 0x173   : > { %v894_v37 = vpop.eup %893  ;;  %v430_v61 = vsel %vm428_vm3, %v429_v42, %v427_v32  ;;  %v434_v38 = vsel %vm433_vm4, %v1479_v12, %v432_v47  ;;  %905 = vrsqrt.f32 %v1516_v28  ;;  %v1539_v6 = vmul.f32 0.003921569, %v382_v33 }
 0x174   : > { %v896_v5 = vpop.eup %895  ;;  %v530_v43 = vadd.f32 1e-06, %v430_v61  ;;  %v437_v44 = vsel %vm435_vm5, %v436_v24, %v434_v38  ;;  %v439_v45 = vmul.f32 %v894_v37, %v1488_v50  ;;  %v464_v12 = vand.u32 2147483648, %v1504_v2 }
 0x175   : > { %v531_v46 = vadd.f32 1e-06, %v437_v44  ;;  %v446_v42 = vmul.f32 %v896_v5, %v1490_v59  ;;  %v1551_v47 = vmul.f32 0.003921569, %v385_v25  ;;  %vm482_vm2 = vcmp.eq.f32.partialorder %v1539_v6, inf }
 0x176   : > { %907 = vrcp.f32 %v530_v43  ;;  %v441_v41 = vsel %vm440_vm6, %v1488_v50, %v439_v45  ;;  %v471_v50 = vand.u32 2147483648, %v1514_v27  ;;  %v478_v45 = vand.u32 2147483648, %v1516_v28 }
 0x177   : > { %v898_v24 = vpop.eup %897  ;;  %909 = vrcp.f32 %v531_v46  ;;  %v444_v13 = vsel %vm442_vm7, %v443_v31, %v441_v41  ;;  %v448_v30 = vsel %vm447_vm8, %v1490_v59, %v446_v42  ;;  %v388_v59 = vpop.xlane.xlu1 %387  ;;  %vm484_vm3 = vcmp.eq.f32.partialorder %v1539_v6, 0.0 }
 0x178   : > { %v900_v32 = vpop.eup %899  ;;  %v532_v33 = vadd.f32 1e-06, %v444_v13  ;;  %v451_v37 = vsel %vm449_vm9, %v450_v26, %v448_v30  ;;  %v453_v61 = vmul.f32 %v898_v24, %v1502_v39  ;;  %911 = vrsqrt.f32 %v1539_v6 }
 0x179   : > { %v533_v38 = vadd.f32 1e-06, %v451_v37  ;;  %v460_v5 = vmul.f32 %v900_v32, %v1504_v2  ;;  %v1577_v30 = vmul.f32 0.003921569, %v388_v59  ;;  %vm489_vm4 = vcmp.eq.f32.partialorder %v1551_v47, inf }
 0x17a   : > { %913 = vrcp.f32 %v532_v33  ;;  %v455_v31 = vsel %vm454_vm10, %v1502_v39, %v453_v61  ;;  %vm491_vm5 = vcmp.eq.f32.partialorder %v1551_v47, 0.0 }
 0x17b   : > { %v902_v26 = vpop.eup %901  ;;  %915 = vrcp.f32 %v533_v38  ;;  %v458_v43 = vsel %vm456_vm11, %v457_v17, %v455_v31  ;;  %v462_v44 = vsel %vm461_vm12, %v1504_v2, %v460_v5  ;;  %v492_v5 = vand.u32 2147483648, %v1551_v47 }
 0x17c   : > { %v904_v25 = vpop.eup %903  ;;  %v534_v46 = vadd.f32 1e-06, %v458_v43  ;;  %v465_v42 = vsel %vm463_vm13, %v464_v12, %v462_v44  ;;  %v467_v41 = vmul.f32 %v902_v26, %v1514_v27  ;;  %917 = vrsqrt.f32 %v1551_v47  ;;  %v391_v43 = vpop.xlane.xlu0 %390 }
 0x17d   : > { %v906_v24 = vpop.eup %905  ;;  %v578_v13 = vmul.f32 %v904_v25, %v1320_v52  ;;  %v579_v39 = vmul.f32 %v904_v25, %v1323_v53  ;;  %v535_v17 = vadd.f32 1e-06, %v465_v42  ;;  %v485_v12 = vand.u32 2147483648, %v1539_v6 }
 0x17e   : > { %919 = vrcp.f32 %v534_v46  ;;  %v469_v32 = vsel %vm468_vm14, %v1514_v27, %v467_v41  ;;  %v474_v2 = vmul.f32 %v906_v24, %v1516_v28  ;;  %v499_v24 = vand.u32 2147483648, %v1577_v30 }
 0x17f   : > { %v621_v33 = vmul.f32 %v1492_v60, %v578_v13  ;;  %v622_v52 = vmul.f32 %v1495_v18, %v579_v39  ;;  %921 = vrcp.f32 %v535_v17  ;;  %v472_v53 = vsel %vm470_vm15, %v471_v50, %v469_v32 }
 0x180   : > { %v908_v37 = vpop.eup %907  ;;  %v536_v61 = vadd.f32 1e-06, %v472_v53  ;;  %v476_v38 = vsel %vm475_vm0, %v1516_v28, %v474_v2  ;;  %923 = vrsqrt.f32 %v1577_v30  ;;  %v1617_v13 = vmul.f32 0.003921569, %v391_v43 }
 0x181   : > { %v910_v31 = vpop.eup %909  ;;  %v665_v59 = vadd.f32 %v1497_v19, %v621_v33  ;;  %v666_v26 = vadd.f32 %v1499_v36, %v622_v52  ;;  %v580_v27 = vmul.f32 %v908_v37, %v1340_v0  ;;  %v581_v50 = vmul.f32 %v908_v37, %v1343_v1 }
 0x182   : > { %v912_v44 = vpop.eup %911  ;;  %v582_v25 = vmul.f32 %v910_v31, %v1326_v54  ;;  %v583_v46 = vmul.f32 %v910_v31, %v1329_v55  ;;  %925 = vrcp.f32 %v536_v61  ;;  %v479_v42 = vsel %vm477_vm1, %v478_v45, %v476_v38 }
 0x183   : > { %697 = vst [vmem:[%s1606_s8] sm:$0xff] %v665_v59  ;;  %698 = vst [vmem:[%s1606_s8 + $0x8] sm:$0xff] %v666_v26  ;;  %v623_v0 = vmul.f32 %v1492_v60, %v580_v27  ;;  %v624_v1 = vmul.f32 %v1495_v18, %v581_v50  ;;  %v537_v54 = vadd.f32 1e-06, %v479_v42  ;;  %v481_v55 = vmul.f32 %v912_v44, %v1539_v6 }
 0x184   : > { %v914_v28 = vpop.eup %913  ;;  %v625_v45 = vmul.f32 %v1492_v60, %v582_v25  ;;  %v626_v41 = vmul.f32 %v1495_v18, %v583_v46  ;;  %vm496_vm6 = vcmp.eq.f32.partialorder %v1577_v30, inf  ;;  %vm498_vm7 = vcmp.eq.f32.partialorder %v1577_v30, 0.0 }
 0x185   : > { %v916_v39 = vpop.eup %915  ;;  %v667_v17 = vadd.f32 %v1497_v19, %v623_v0  ;;  %v668_v32 = vadd.f32 %v1499_v36, %v624_v1  ;;  %v584_v2 = vmul.f32 %v914_v28, %v1346_v3  ;;  %v585_v33 = vmul.f32 %v914_v28, %v1349_v4 }
 0x186   : > { %v918_v52 = vpop.eup %917  ;;  %v669_v53 = vadd.f32 %v1497_v19, %v625_v45  ;;  %v670_v37 = vadd.f32 %v1499_v36, %v626_v41  ;;  %v586_v61 = vmul.f32 %v916_v39, %v1360_v9  ;;  %v587_v38 = vmul.f32 %v916_v39, %v1363_v23 }
 0x187   : > { %699 = vst [vmem:[%s1606_s8 + $0x10] sm:$0xff] %v667_v17  ;;  %700 = vst [vmem:[%s1606_s8 + $0x18] sm:$0xff] %v668_v32  ;;  %v627_v31 = vmul.f32 %v1492_v60, %v584_v2  ;;  %v628_v3 = vmul.f32 %v1495_v18, %v585_v33  ;;  %927 = vrcp.f32 %v537_v54  ;;  %v483_v4 = vsel %vm482_vm2, %v1539_v6, %v481_v55  ;;  %v394_v54 = vpop.xlane.xlu1 %393 }
 0x188   : > { %v920_v59 = vpop.eup %919  ;;  %701 = vst [vmem:[%s1606_s8 + $0x20] sm:$0xff] %v669_v53  ;;  %702 = vst [vmem:[%s1606_s8 + $0x28] sm:$0xff] %v670_v37  ;;  %v629_v9 = vmul.f32 %v1492_v60, %v586_v61  ;;  %v630_v23 = vmul.f32 %v1495_v18, %v587_v38  ;;  %v486_v26 = vsel %vm484_vm3, %v485_v12, %v483_v4  ;;  %vm503_vm8 = vcmp.eq.f32.partialorder %v1617_v13, inf }
 0x189   : > { %v488_v27 = vmul.f32 %v918_v52, %v1551_v47  ;;  %v922_v50 = vpop.eup %921  ;;  %v671_v43 = vadd.f32 %v1497_v19, %v627_v31  ;;  %v672_v44 = vadd.f32 %v1499_v36, %v628_v3  ;;  %v588_v25 = vmul.f32 %v920_v59, %v1366_v29 }
 0x18a   : > { %v589_v46 = vmul.f32 %v920_v59, %v1369_v34  ;;  %v924_v42 = vpop.eup %923  ;;  %v673_v0 = vadd.f32 %v1497_v19, %v629_v9  ;;  %v674_v1 = vadd.f32 %v1499_v36, %v630_v23  ;;  %v590_v6 = vmul.f32 %v922_v50, %v1380_v48 }
 0x18b   : > { %v591_v12 = vmul.f32 %v922_v50, %v1383_v49  ;;  %703 = vst [vmem:[%s1606_s8 + $0x30] sm:$0xff] %v671_v43  ;;  %704 = vst [vmem:[%s1606_s8 + $0x38] sm:$0xff] %v672_v44  ;;  %v631_v55 = vmul.f32 %v1492_v60, %v588_v25  ;;  %v538_v29 = vadd.f32 1e-06, %v486_v26  ;;  %v490_v34 = vsel %vm489_vm4, %v1551_v47, %v488_v27  ;;  %v400_v38 = vpop.xlane.xlu1 %399 }
 0x18c   : > { %v632_v28 = vmul.f32 %v1495_v18, %v589_v46  ;;  %v926_v45 = vpop.eup %925  ;;  %705 = vst [vmem:[%s1606_s8 + $0x40] sm:$0xff] %v673_v0  ;;  %706 = vst [vmem:[%s1606_s8 + $0x48] sm:$0xff] %v674_v1  ;;  %v633_v48 = vmul.f32 %v1492_v60, %v590_v6  ;;  %v493_v41 = vsel %vm491_vm5, %v492_v5, %v490_v34  ;;  %v1691_v26 = vmul.f32 0.003921569, %v394_v54 }
 0x18d   : > { %v634_v49 = vmul.f32 %v1495_v18, %v591_v12  ;;  %v495_v39 = vmul.f32 %v924_v42, %v1577_v30  ;;  %v675_v17 = vadd.f32 %v1497_v19, %v631_v55  ;;  %v592_v2 = vmul.f32 %v926_v45, %v1386_v51  ;;  %v397_v51 = vpop.xlane.xlu0 %396 }
 0x18e   : > { %v676_v32 = vadd.f32 %v1499_v36, %v632_v28  ;;  %v593_v33 = vmul.f32 %v926_v45, %v1389_v56  ;;  %v677_v52 = vadd.f32 %v1497_v19, %v633_v48  ;;  %929 = vrcp.f32 %v538_v29 }
 0x18f   : > { %v678_v53 = vadd.f32 %v1499_v36, %v634_v49  ;;  %v539_v37 = vadd.f32 1e-06, %v493_v41  ;;  %707 = vst [vmem:[%s1606_s8 + $0x50] sm:$0xff] %v675_v17  ;;  %v635_v47 = vmul.f32 %v1492_v60, %v592_v2  ;;  %v497_v61 = vsel %vm496_vm6, %v1577_v30, %v495_v39 }
 0x190   : > { %708 = vst [vmem:[%s1606_s8 + $0x58] sm:$0xff] %v676_v32  ;;  %v636_v5 = vmul.f32 %v1495_v18, %v593_v33  ;;  %931 = vrsqrt.f32 %v1617_v13  ;;  %709 = vst [vmem:[%s1606_s8 + $0x60] sm:$0xff] %v677_v52  ;;  %v500_v56 = vsel %vm498_vm7, %v499_v24, %v497_v61  ;;  %v1693_v27 = vmul.f32 0.003921569, %v397_v51 }
 0x191   : > { %710 = vst [vmem:[%s1606_s8 + $0x68] sm:$0xff] %v678_v53  ;;  %933 = vrcp.f32 %v539_v37  ;;  %v928_v31 = vpop.eup %927  ;;  %v679_v3 = vadd.f32 %v1497_v19, %v635_v47  ;;  %v540_v59 = vadd.f32 1e-06, %v500_v56  ;;  %v1697_v30 = vmul.f32 0.003921569, %v400_v38 }
 0x192   : > { %v680_v4 = vadd.f32 %v1499_v36, %v636_v5  ;;  %v594_v9 = vmul.f32 %v928_v31, %v1400_v62  ;;  %v595_v23 = vmul.f32 %v928_v31, %v1403_v63  ;;  %vm505_vm9 = vcmp.eq.f32.partialorder %v1617_v13, 0.0 }
 0x193   : > { %711 = vst [vmem:[%s1606_s8 + $0x70] sm:$0xff] %v679_v3  ;;  %935 = vrcp.f32 %v540_v59  ;;  %vm510_vm10 = vcmp.eq.f32.partialorder %v1691_v26, inf  ;;  %vm512_vm11 = vcmp.eq.f32.partialorder %v1691_v26, 0.0  ;;  %v513_v41 = vand.u32 2147483648, %v1691_v26 }
 0x194   : > { %712 = vst [vmem:[%s1606_s8 + $0x78] sm:$0xff] %v680_v4  ;;  %v637_v24 = vmul.f32 %v1492_v60, %v594_v9  ;;  %v638_v50 = vmul.f32 %v1495_v18, %v595_v23  ;;  %937 = vrsqrt.f32 %v1691_v26  ;;  %vm517_vm12 = vcmp.eq.f32.partialorder %v1693_v27, inf }
 0x195   : > { %939 = vrsqrt.f32 %v1693_v27  ;;  %vm519_vm13 = vcmp.eq.f32.partialorder %v1693_v27, 0.0  ;;  %v520_v37 = vand.u32 2147483648, %v1693_v27  ;;  %vm524_vm14 = vcmp.eq.f32.partialorder %v1697_v30, inf }
 0x196   : > { %v681_v62 = vadd.f32 %v1497_v19, %v637_v24  ;;  %v682_v63 = vadd.f32 %v1499_v36, %v638_v50  ;;  %941 = vrsqrt.f32 %v1697_v30  ;;  %v527_v4 = vand.u32 2147483648, %v1697_v30 }
 0x197   : > { %vm526_vm15 = vcmp.eq.f32.partialorder %v1697_v30, 0.0 }
 0x198   : > { %v930_v43 = vpop.eup %929  ;;  %713 = vst [vmem:[%s1606_s8 + $0x80] sm:$0xff] %v681_v62  ;;  %714 = vst [vmem:[%s1606_s8 + $0x88] sm:$0xff] %v682_v63 }
 0x199   : > { %v596_v25 = vmul.f32 %v930_v43, %v1406_v7  ;;  %v597_v46 = vmul.f32 %v930_v43, %v1409_v10  ;;  %v506_v10 = vand.u32 2147483648, %v1617_v13 }
 0x19a   : > { %v932_v44 = vpop.eup %931 }
 0x19b   : > { %v934_v42 = vpop.eup %933  ;;  %v502_v0 = vmul.f32 %v932_v44, %v1617_v13  ;;  %v639_v1 = vmul.f32 %v1492_v60, %v596_v25  ;;  %v640_v6 = vmul.f32 %v1495_v18, %v597_v46 }
 0x19c   : > { %v598_v12 = vmul.f32 %v934_v42, %v1420_v22  ;;  %v599_v54 = vmul.f32 %v934_v42, %v1423_v8 }
 0x19d   : > { %v504_v7 = vsel %vm503_vm8, %v1617_v13, %v502_v0  ;;  %v936_v55 = vpop.eup %935  ;;  %v683_v28 = vadd.f32 %v1497_v19, %v639_v1  ;;  %v684_v29 = vadd.f32 %v1499_v36, %v640_v6 }
 0x19e   : > { %v641_v34 = vmul.f32 %v1492_v60, %v598_v12  ;;  %v642_v22 = vmul.f32 %v1495_v18, %v599_v54  ;;  %v938_v8 = vpop.eup %937  ;;  %v600_v45 = vmul.f32 %v936_v55, %v1426_v35  ;;  %v601_v48 = vmul.f32 %v936_v55, %v1429_v40 }
 0x19f   : > { %v507_v49 = vsel %vm505_vm9, %v506_v10, %v504_v7  ;;  %v940_v39 = vpop.eup %939  ;;  %715 = vst [vmem:[%s1606_s8 + $0x90] sm:$0xff] %v683_v28  ;;  %716 = vst [vmem:[%s1606_s8 + $0x98] sm:$0xff] %v684_v29  ;;  %v509_v33 = vmul.f32 %v938_v8, %v1691_v26 }
 0x1a0   : > { %v685_v17 = vadd.f32 %v1497_v19, %v641_v34  ;;  %v686_v32 = vadd.f32 %v1499_v36, %v642_v22  ;;  %v541_v2 = vadd.f32 1e-06, %v507_v49  ;;  %v643_v35 = vmul.f32 %v1492_v60, %v600_v45  ;;  %v942_v52 = vpop.eup %941 }
 0x1a1   : > { %v644_v40 = vmul.f32 %v1495_v18, %v601_v48  ;;  %v516_v13 = vmul.f32 %v940_v39, %v1693_v27  ;;  %v511_v53 = vsel %vm510_vm10, %v1691_v26, %v509_v33  ;;  %v523_v31 = vmul.f32 %v942_v52, %v1697_v30 }
 0x1a2   : > { %717 = vst [vmem:[%s1606_s8 + $0xa0] sm:$0xff] %v685_v17  ;;  %718 = vst [vmem:[%s1606_s8 + $0xa8] sm:$0xff] %v686_v32  ;;  %943 = vrcp.f32 %v541_v2  ;;  %v687_v47 = vadd.f32 %v1497_v19, %v643_v35  ;;  %v514_v61 = vsel %vm512_vm11, %v513_v41, %v511_v53 }
 0x1a3   : > { %v688_v5 = vadd.f32 %v1499_v36, %v644_v40  ;;  %v518_v51 = vsel %vm517_vm12, %v1693_v27, %v516_v13  ;;  %v542_v56 = vadd.f32 1e-06, %v514_v61  ;;  %v525_v59 = vsel %vm524_vm14, %v1697_v30, %v523_v31 }
 0x1a4   : > { %v521_v38 = vsel %vm519_vm13, %v520_v37, %v518_v51  ;;  %719 = vst [vmem:[%s1606_s8 + $0xb0] sm:$0xff] %v687_v47  ;;  %v528_v9 = vsel %vm526_vm15, %v527_v4, %v525_v59 }
 0x1a5   : > { %720 = vst [vmem:[%s1606_s8 + $0xb8] sm:$0xff] %v688_v5  ;;  %v543_v3 = vadd.f32 1e-06, %v521_v38  ;;  %945 = vrcp.f32 %v542_v56  ;;  %v544_v23 = vadd.f32 1e-06, %v528_v9 }
 0x1a7   : > { %947 = vrcp.f32 %v543_v3 }
 0x1a8   : > { %949 = vrcp.f32 %v544_v23 }
 0x1ac   : > { %v944_v26 = vpop.eup %943 }
 0x1ad   : > { %v602_v27 = vmul.f32 %v944_v26, %v1440_v14  ;;  %v603_v24 = vmul.f32 %v944_v26, %v1443_v15 }
 0x1af   : > { %v645_v50 = vmul.f32 %v1492_v60, %v602_v27  ;;  %v646_v62 = vmul.f32 %v1495_v18, %v603_v24  ;;  %v946_v63 = vpop.eup %945 }
 0x1b0   : > { %v604_v25 = vmul.f32 %v946_v63, %v1446_v57  ;;  %v605_v46 = vmul.f32 %v946_v63, %v1449_v58 }
 0x1b1   : > { %v948_v43 = vpop.eup %947  ;;  %v689_v44 = vadd.f32 %v1497_v19, %v645_v50  ;;  %v690_v30 = vadd.f32 %v1499_v36, %v646_v62 }
 0x1b2   : > { %v606_v14 = vmul.f32 %v948_v43, %v1460_v20  ;;  %v607_v15 = vmul.f32 %v948_v43, %v1463_v21  ;;  %v647_v42 = vmul.f32 %v1492_v60, %v604_v25  ;;  %v648_v0 = vmul.f32 %v1495_v18, %v605_v46  ;;  %v950_v1 = vpop.eup %949 }
 0x1b3   : > { %721 = vst [vmem:[%s1606_s8 + $0xc0] sm:$0xff] %v689_v44  ;;  %722 = vst [vmem:[%s1606_s8 + $0xc8] sm:$0xff] %v690_v30  ;;  %v608_v21 = vmul.f32 %v950_v1, %v1466_v11  ;;  %v609_v12 = vmul.f32 %v950_v1, %v1469_v16 }
 0x1b4   : > { %v649_v57 = vmul.f32 %v1492_v60, %v606_v14  ;;  %v650_v6 = vmul.f32 %v1495_v18, %v607_v15  ;;  %v691_v58 = vadd.f32 %v1497_v19, %v647_v42  ;;  %v692_v20 = vadd.f32 %v1499_v36, %v648_v0 }
 0x1b5   : > { %v651_v10 = vmul.f32 %v1492_v60, %v608_v21  ;;  %v652_v55 = vmul.f32 %v1495_v18, %v609_v12 }
 0x1b6   : > { %v693_v54 = vadd.f32 %v1497_v19, %v649_v57  ;;  %v694_v7 = vadd.f32 %v1499_v36, %v650_v6  ;;  %723 = vst [vmem:[%s1606_s8 + $0xd0] sm:$0xff] %v691_v58  ;;  %724 = vst [vmem:[%s1606_s8 + $0xd8] sm:$0xff] %v692_v20 }
 0x1b7   : > { %v695_v11 = vadd.f32 %v1497_v19, %v651_v10  ;;  %v696_v16 = vadd.f32 %v1499_v36, %v652_v55 }
 0x1b8   : > { %725 = vst [vmem:[%s1606_s8 + $0xe0] sm:$0xff] %v693_v54  ;;  %726 = vst [vmem:[%s1606_s8 + $0xe8] sm:$0xff] %v694_v7 }
 0x1b9   : > { %727 = vst [vmem:[%s1606_s8 + $0xf0] sm:$0xff] %v695_v11  ;;  %728 = vst [vmem:[%s1606_s8 + $0xf8] sm:$0xff] %v696_v16 }
 0x1ba   : > { %994 = shalt.err (!%p991_p2)
}
 0x1bb   : > { %s995_s9 = scalar_lea.hbm %s1791_s26, 4096  ;;  %s999_s23 = scalar_lea.hbm %s1844_s3, 8192 }
 0x1bc   : > { %p996_p4 = scmp.ne.s32.totalorder %s1791_s26, %s995_s9  ;;  %p1000_p9 = scmp.lt.u32.totalorder %s1791_s26, %s1844_s3 }
 0x1bd   : > { %p1001_p1 = scmp.lt.u32.totalorder %s999_s23, %s995_s9  ;;  %p1003_p6 = scmp.lt.u32.totalorder %s995_s9, %s1791_s26 }
 0x1be   : > { %p997_p5 = pnand %p996_p4, %p1851_p11 }
 0x1bf   : > { %p1002_p3 = por %p1001_p1, %p1000_p9 }
 0x1c0   : > { %p998_p7 = pneg %p997_p5 }
 0x1c1   : > { %p1004_p12 = por %p1003_p6, %p1002_p3 }
 0x1c3   : > { %p1005_p13 = pnand %p1004_p12, %p998_p7 }
 0x1c5   : > { %1008 = shalt.err (!%p1005_p13)
}
 0x1c6   : > { %s1053_s7 = smov 256   ;;  %s1054_s8 = smov 16  }
 0x1c7   : > { %839 = dma.vmem_to_hbm [thread:$0]  (%p1851_p11), %s1793_s19, 4096, %s1791_s26, %s730_s16, %s1053_s7, %s1053_s7, %s1054_s8  }
 0x1c8 PF: > { %s759_s17 = sand.u32 1, %s1035_s12   ;;  %p1852_p8 = scmp.ne.s32.totalorder %s1849_s25, 0 }
 0x1c9   : > { %p1853_p10 = scmp.ge.s32.totalorder %s1047_s15, 2  ;;  %s760_s20 = scalar_lea.sflag [#allocation4], %s759_s17 }
 0x1cb   : > { %p846_p0 = pnand %p1853_p10, %p1852_p8 }
 0x1cd   : > { %1030 = dma.done.wait (!%p846_p0), %s760_s20, 4096  }
 0x1ce   : > { %1032 = vsyncadd (!%p846_p0), %s760_s20, 4294963200  ;;  %p16_p2 = scmp.ge.s32.totalorder %s1100_s18, 4   ;;  %s1854_s12 = smov %s1039_s13 }
 0x1cf   : > { %s1855_s13 = smov %s1043_s14  ;;  %s1856_s14 = smov %s1112_s21 }
 0x1d0   : > { %s1857_s15 = smov %s1100_s18  ;;  %18 = sbr.rel (!%p16_p2) target bundleno = 5 (0x5), region = 77 }
 0x1d7   :  { %765 = vsyncpa [#allocation3], 1 }
 0x1d8   :  { %767 = vsyncpa [#allocation3 + $0x1], 1 }
 0x1d9   :  { %768 = vsyncpa [#allocation4], 1 }
 0x1da   :  { %770 = vsyncpa [#allocation4 + $0x1], 1 }

</bundles_post_ra>
